<compile_context>
chip_gen: v7x
topology: tpu7x:2x2x1
jax: 0.10.0
libtpu: 0.0.40
codegen_flags: <defaults>
</compile_context>

<pallas_src>
import math
import functools

import jax
import jax.numpy as jnp
from jax.experimental import pallas as pl
from jax.experimental.pallas import tpu as pltpu

LN_EPS = 1e-12                       # BertLayerNorm eps in pytorch_pretrained_bert


# ----------------------------------------------------------------------------
# Hardware-aware tile / VMEM configuration
# ----------------------------------------------------------------------------
@functools.lru_cache(maxsize=1)
def _hw_config():
    """Tile targets + scoped-VMEM limit. Tiles are identical across
    generations (they only use a few MiB); the scoped limit tracks physical
    VMEM (128 MiB on v5e/v6e, 64 MiB on v7x)."""
    try:
        kind = jax.devices()[0].device_kind.lower()
    except Exception:
        kind = ""
    if ("v5" in kind) or ("v6" in kind):
        return {"tm": 1024, "tn": 512, "tk": 512, "vmem": 64 * 1024 * 1024}
    # v7x and unknown devices
    return {"tm": 1024, "tn": 512, "tk": 512, "vmem": 48 * 1024 * 1024}


def _tile(dim, target, align):
    """Largest tile <= target that divides `dim` and is `align`-aligned.

    Falls back to the full dim only when no aligned divisor exists (a
    full-extent block is always layout-legal)."""
    if dim <= target:
        return dim
    start = (target // align) * align
    for d in range(start, align - 1, -align):
        if dim % d == 0:
            return d
    # TODO(synk): pad M/N/K to a tileable size instead of using a full-dim
    # block for pathological (prime-ish) dims; the fallback can be VMEM-heavy.
    return dim


# ----------------------------------------------------------------------------
# In-kernel math helpers
# ----------------------------------------------------------------------------
def _erf(x):
    # Abramowitz & Stegun 7.1.26 (|err| < 1.5e-7); exp goes to the EUP.
    a1, a2, a3, a4, a5 = 0.254829592, -0.284496736, 1.421413741, -1.453152027, 1.061405429
    p = 0.3275911
    sign = jnp.where(x >= 0.0, 1.0, -1.0)
    ax = jnp.abs(x)
    t = 1.0 / (1.0 + p * ax)
    y = 1.0 - ((((a5 * t + a4) * t + a3) * t + a2) * t + a1) * t * jnp.exp(-ax * ax)
    return sign * y


def _gelu(x):
    # BERT gelu: x * 0.5 * (1 + erf(x / sqrt(2)))  (epilogue math kept in f32)
    return x * 0.5 * (1.0 + _erf(x * (1.0 / math.sqrt(2.0))))


# ----------------------------------------------------------------------------
# Tiled dense matmul, optional fused GELU epilogue
# ----------------------------------------------------------------------------
def _matmul_kernel(x_ref, w_ref, b_ref, o_ref, acc_ref, *, activation):
    k = pl.program_id(2)

    @pl.when(k == 0)
    def _():
        acc_ref[...] = jnp.zeros_like(acc_ref)

    acc_ref[...] += jnp.dot(x_ref[...], w_ref[...],
                            preferred_element_type=jnp.float32)

    @pl.when(k == pl.num_programs(2) - 1)
    def _():
        y = acc_ref[...] + b_ref[...]                # bias kept in f32
        if activation == "gelu":
            y = _gelu(y)
        o_ref[...] = y.astype(o_ref.dtype)


def dense(x, w, b, activation=None, out_dtype=jnp.bfloat16):
    """(M, K) @ (K, N) + (1, N)  -> (M, N).

    Expects prepared params: `w` bf16, `b` f32 of shape (1, N) -- no
    per-forward casts/reshapes in this wrapper."""
    m, kdim = x.shape
    n = w.shape[1]
    hw = _hw_config()
    tm = _tile(m, hw["tm"], 8)
    tn = _tile(n, hw["tn"], 128)
    tk = _tile(kdim, hw["tk"], 128)
    grid = (m // tm, n // tn, kdim // tk)
    return pl.pallas_call(
        functools.partial(_matmul_kernel, activation=activation),
        grid=grid,
        in_specs=[pl.BlockSpec((tm, tk), lambda i, j, kk: (i, kk)),
                  pl.BlockSpec((tk, tn), lambda i, j, kk: (kk, j)),
                  pl.BlockSpec((1, tn), lambda i, j, kk: (0, j))],
        out_specs=pl.BlockSpec((tm, tn), lambda i, j, kk: (i, j)),
        out_shape=jax.ShapeDtypeStruct((m, n), out_dtype),
        scratch_shapes=[pltpu.VMEM((tm, tn), jnp.float32)],
        compiler_params=pltpu.CompilerParams(
            dimension_semantics=("parallel", "parallel", "arbitrary"),
            vmem_limit_bytes=hw["vmem"]),
    )(x, w, b)


# ----------------------------------------------------------------------------
# Tiled dense matmul with fused bias + residual-add + LayerNorm epilogue
# (N is kept untiled so LN statistics span the full hidden dim.)
# ----------------------------------------------------------------------------
def _matmul_ln_kernel(x_ref, w_ref, b_ref, r_ref, g_ref, bb_ref, o_ref, acc_ref):
    k = pl.program_id(1)

    @pl.when(k == 0)
    def _():
        acc_ref[...] = jnp.zeros_like(acc_ref)

    acc_ref[...] += jnp.dot(x_ref[...], w_ref[...],
                            preferred_element_type=jnp.float32)

    @pl.when(k == pl.num_programs(1) - 1)
    def _():
        y = acc_ref[...] + b_ref[...] + r_ref[...].astype(jnp.float32)
        mu = jnp.mean(y, axis=-1, keepdims=True)
        yc = y - mu
        var = jnp.mean(yc * yc, axis=-1, keepdims=True)
        o_ref[...] = (yc * jax.lax.rsqrt(var + LN_EPS) * g_ref[...]
                      + bb_ref[...]).astype(o_ref.dtype)


def dense_add_ln(x, w, b, residual, gamma, beta, out_dtype=jnp.bfloat16):
    """LayerNorm((x @ w + b) + residual) fully fused.  Prepared params:
    `w` bf16, `b`/`gamma`/`beta` f32 of shape (1, N)."""
    m, kdim = x.shape
    n = w.shape[1]
    hw = _hw_config()
    tm = _tile(m, hw["tm"], 8)
    tk = _tile(kdim, hw["tk"], 128)
    grid = (m // tm, kdim // tk)
    return pl.pallas_call(
        _matmul_ln_kernel,
        grid=grid,
        in_specs=[pl.BlockSpec((tm, tk), lambda i, kk: (i, kk)),
                  pl.BlockSpec((tk, n), lambda i, kk: (kk, 0)),
                  pl.BlockSpec((1, n), lambda i, kk: (0, 0)),
                  pl.BlockSpec((tm, n), lambda i, kk: (i, 0)),
                  pl.BlockSpec((1, n), lambda i, kk: (0, 0)),
                  pl.BlockSpec((1, n), lambda i, kk: (0, 0))],
        out_specs=pl.BlockSpec((tm, n), lambda i, kk: (i, 0)),
        out_shape=jax.ShapeDtypeStruct((m, n), out_dtype),
        scratch_shapes=[pltpu.VMEM((tm, n), jnp.float32)],
        compiler_params=pltpu.CompilerParams(
            dimension_semantics=("parallel", "arbitrary"),
            vmem_limit_bytes=hw["vmem"]),
    )(x, w, b, residual, gamma, beta)


# ----------------------------------------------------------------------------
# Standalone tiled LayerNorm (only for the embedding output, which follows a
# gather and has no matmul to fuse into)
# ----------------------------------------------------------------------------
def _layernorm_kernel(x_ref, g_ref, b_ref, o_ref):
    x = x_ref[...].astype(jnp.float32)
    mu = jnp.mean(x, axis=-1, keepdims=True)
    xc = x - mu
    var = jnp.mean(xc * xc, axis=-1, keepdims=True)
    o_ref[...] = (xc * jax.lax.rsqrt(var + LN_EPS) * g_ref[...]
                  + b_ref[...]).astype(o_ref.dtype)


def layer_norm(x, gamma, beta, out_dtype=jnp.bfloat16):
    m, h = x.shape
    hw = _hw_config()
    tm = _tile(m, hw["tm"], 8)
    return pl.pallas_call(
        _layernorm_kernel,
        grid=(m // tm,),
        in_specs=[pl.BlockSpec((tm, h), lambda i: (i, 0)),
                  pl.BlockSpec((1, h), lambda i: (0, 0)),
                  pl.BlockSpec((1, h), lambda i: (0, 0))],
        out_specs=pl.BlockSpec((tm, h), lambda i: (i, 0)),
        out_shape=jax.ShapeDtypeStruct((m, h), out_dtype),
        compiler_params=pltpu.CompilerParams(
            dimension_semantics=("parallel",),
            vmem_limit_bytes=hw["vmem"]),
    )(x, gamma, beta)


# ----------------------------------------------------------------------------
# Self-attention: one batch per grid step, fused (S, 3H) QKV block consumed
# directly (no XLA Q/K/V slices), lane-dense (S, H) output written per head.
# 1/sqrt(dh) is folded into the Q projection weights at prepare time.
# ----------------------------------------------------------------------------
def _attention_kernel(qkv_ref, m_ref, o_ref, *, num_heads, hidden):
    bias = m_ref[0]                       # (1, S) f32, broadcast over query rows
    qkv = qkv_ref[0]                      # (S, 3H) bf16
    dh = hidden // num_heads

    for hh in range(num_heads):           # static unroll over heads
        lo = hh * dh
        q = qkv[:, lo:lo + dh]
        k = qkv[:, hidden + lo:hidden + lo + dh]
        v = qkv[:, 2 * hidden + lo:2 * hidden + lo + dh]
        s = jax.lax.dot_general(q, k, (((1,), (1,)), ((), ())),
                                preferred_element_type=jnp.float32)
        s = s + bias
        s = s - jnp.max(s, axis=-1, keepdims=True)
        p = jnp.exp(s)
        p = p * pl.reciprocal(jnp.sum(p, axis=-1, keepdims=True), approx=True)
        ctx = jnp.dot(p.astype(v.dtype), v, preferred_element_type=jnp.float32)
        # store this head's context immediately -> only one (S,dh) partial live
        o_ref[0, :, lo:lo + dh] = ctx.astype(o_ref.dtype)
    # TODO(synk): for long sequences (S >= ~1-2k) switch to a head-major
    # (B, nh, S, dh) layout with heads as a grid axis and flash-style
    # query/KV tiling (online-softmax accumulator) so per-step VMEM stays
    # O(tq*tk) instead of O(S*S) per head.


def attention(qkv, mask_bias, num_heads):
    """qkv: (B, S, 3H) bf16 fused-projection output; mask_bias: (B, 1, S) f32."""
    b, s, h3 = qkv.shape
    h = h3 // 3
    hw = _hw_config()
    return pl.pallas_call(
        functools.partial(_attention_kernel, num_heads=num_heads, hidden=h),
        grid=(b,),
        in_specs=[pl.BlockSpec((1, s, h3), lambda i: (i, 0, 0)),
                  pl.BlockSpec((1, 1, s), lambda i: (i, 0, 0))],
        out_specs=pl.BlockSpec((1, s, h), lambda i: (i, 0, 0)),
        out_shape=jax.ShapeDtypeStruct((b, s, h), jnp.bfloat16),
        compiler_params=pltpu.CompilerParams(
            dimension_semantics=("parallel",),
            vmem_limit_bytes=hw["vmem"]),
    )(qkv, mask_bias)


# ----------------------------------------------------------------------------
# Parameter construction (deterministic, synthetic — no checkpoint loading)
# ----------------------------------------------------------------------------
class BertConfig:
    def __init__(self, vocab_size=100, hidden_size=32, num_hidden_layers=2,
                 num_attention_heads=4, intermediate_size=64,
                 max_position_embeddings=64, type_vocab_size=2):
        self.vocab_size = vocab_size
        self.hidden_size = hidden_size
        self.num_hidden_layers = num_hidden_layers
        self.num_attention_heads = num_attention_heads
        self.intermediate_size = intermediate_size
        self.max_position_embeddings = max_position_embeddings
        self.type_vocab_size = type_vocab_size


def init_params(cfg, key):
    H, I = cfg.hidden_size, cfg.intermediate_size
    std = 0.02

    def nrm(k, shape):
        return (std * jax.random.normal(k, shape)).astype(jnp.float32)

    keys = jax.random.split(key, 3 + cfg.num_hidden_layers)
    params = {
        "word_emb": nrm(keys[0], (cfg.vocab_size, H)),
        "pos_emb": nrm(keys[1], (cfg.max_position_embeddings, H)),
        "type_emb": nrm(keys[2], (cfg.type_vocab_size, H)),
        "emb_ln_g": jnp.ones((H,), jnp.float32),
        "emb_ln_b": jnp.zeros((H,), jnp.float32),
        "layers": [],
    }
    for li in range(cfg.num_hidden_layers):
        lk = jax.random.split(keys[3 + li], 6)
        params["layers"].append({
            "q_w": nrm(lk[0], (H, H)), "q_b": jnp.zeros((H,), jnp.float32),
            "k_w": nrm(lk[1], (H, H)), "k_b": jnp.zeros((H,), jnp.float32),
            "v_w": nrm(lk[2], (H, H)), "v_b": jnp.zeros((H,), jnp.float32),
            "ao_w": nrm(lk[3], (H, H)), "ao_b": jnp.zeros((H,), jnp.float32),
            "ao_ln_g": jnp.ones((H,), jnp.float32), "ao_ln_b": jnp.zeros((H,), jnp.float32),
            "i_w": nrm(lk[4], (H, I)), "i_b": jnp.zeros((I,), jnp.float32),
            "o_w": nrm(lk[5], (I, H)), "o_b": jnp.zeros((H,), jnp.float32),
            "o_ln_g": jnp.ones((H,), jnp.float32), "o_ln_b": jnp.zeros((H,), jnp.float32),
        })
    return params


def prepare_params(params, num_heads):
    """One-time (outside the per-forward path) weight preprocessing:
    bf16 casts, fused QKV concat, (1,N) f32 biases / LN params, and the
    1/sqrt(dh) attention scale folded into the Q projection."""
    H = params["emb_ln_g"].shape[0]
    dh = H // num_heads
    scale = 1.0 / math.sqrt(dh)

    def row(v):                       # (N,) f32 -> (1, N) f32
        return jnp.asarray(v, jnp.float32).reshape(1, -1)

    prep = {
        "word_emb": params["word_emb"],
        "pos_emb": params["pos_emb"],
        "type_emb": params["type_emb"],
        "emb_ln_g": row(params["emb_ln_g"]),
        "emb_ln_b": row(params["emb_ln_b"]),
        "layers": [],
    }
    for lyr in params["layers"]:
        # scale*(q.k) == (scale*q).k  -> fold scale into Q weights & bias
        wqkv = jnp.concatenate([lyr["q_w"] * scale, lyr["k_w"], lyr["v_w"]], axis=1)
        bqkv = jnp.concatenate([lyr["q_b"] * scale, lyr["k_b"], lyr["v_b"]], axis=0)
        prep["layers"].append({
            "qkv_w": wqkv.astype(jnp.bfloat16), "qkv_b": row(bqkv),
            "ao_w": lyr["ao_w"].astype(jnp.bfloat16), "ao_b": row(lyr["ao_b"]),
            "ao_ln_g": row(lyr["ao_ln_g"]), "ao_ln_b": row(lyr["ao_ln_b"]),
            "i_w": lyr["i_w"].astype(jnp.bfloat16), "i_b": row(lyr["i_b"]),
            "o_w": lyr["o_w"].astype(jnp.bfloat16), "o_b": row(lyr["o_b"]),
            "o_ln_g": row(lyr["o_ln_g"]), "o_ln_b": row(lyr["o_ln_b"]),
        })
    return prep


# ----------------------------------------------------------------------------
# Forward pass (== Bert.forward: returns list of all encoded layers)
# ----------------------------------------------------------------------------
def bert_forward(params, cfg, input_ids, token_type_ids, attention_mask):
    B, S = input_ids.shape
    H = cfg.hidden_size
    nh = cfg.num_attention_heads
    M = B * S

    # ---- BertEmbeddings (gathers are XLA glue; LayerNorm in Pallas) ----
    pos_ids = jnp.arange(S)
    emb = (params["word_emb"][input_ids]
           + params["pos_emb"][pos_ids][None, :, :]
           + params["type_emb"][token_type_ids])
    x2d = layer_norm(emb.reshape(M, H), params["emb_ln_g"], params["emb_ln_b"])
    # dropout: eval-mode no-op

    # extended attention mask bias: (1 - mask) * -10000, one row per batch
    bias = ((1.0 - attention_mask.astype(jnp.float32)) * -10000.0).reshape(B, 1, S)

    encoded_layers = []
    for layer in params["layers"]:
        # ---- self attention: fused QKV projection -> (B, S, 3H) directly ----
        qkv = dense(x2d, layer["qkv_w"], layer["qkv_b"]).reshape(B, S, 3 * H)

        ctx = attention(qkv, bias, nh).reshape(M, H)

        # attention output projection + residual + LayerNorm (fused)
        attn_out = dense_add_ln(ctx, layer["ao_w"], layer["ao_b"], x2d,
                                layer["ao_ln_g"], layer["ao_ln_b"])

        # ---- feed-forward ----
        inter = dense(attn_out, layer["i_w"], layer["i_b"], activation="gelu")
        x2d = dense_add_ln(inter, layer["o_w"], layer["o_b"], attn_out,
                           layer["o_ln_g"], layer["o_ln_b"])

        # kept in bf16: f32 up-cast after bf16 compute adds no precision and
        # doubles the per-layer HBM writeback.
        encoded_layers.append(x2d.reshape(B, S, H))

    # output_all_encoded_layers=True (BertModel default) -> list of all layers
    return encoded_layers


# ----------------------------------------------------------------------------
if __name__ == "__main__":
    cfg = BertConfig(vocab_size=100, hidden_size=32, num_hidden_layers=2,
                     num_attention_heads=4, intermediate_size=64,
                     max_position_embeddings=64, type_vocab_size=2)

    key = jax.random.PRNGKey(0)
    k_par, k_ids, k_seg = jax.random.split(key, 3)
    raw_params = init_params(cfg, k_par)
    params = prepare_params(raw_params, cfg.num_attention_heads)

    B, S = 2, 8
    x = jax.random.randint(k_ids, (B, S), 0, cfg.vocab_size, dtype=jnp.int32)
    segs = jax.random.randint(k_seg, (B, S), 0, cfg.type_vocab_size, dtype=jnp.int32)
    mask = jnp.ones((B, S), jnp.float32).at[1, 6:].set(0.0)   # pad last 2 tokens of batch 1

    encoded_layers = bert_forward(params, cfg, x, segs, mask)
    encoded_layers = jax.block_until_ready(encoded_layers)

    assert len(encoded_layers) == cfg.num_hidden_layers
    assert all(l.shape == (B, S, cfg.hidden_size) for l in encoded_layers)
    assert all(bool(jnp.all(jnp.isfinite(l.astype(jnp.float32)))) for l in encoded_layers)
    print("KERNEL_OK")
</pallas_src>

<mosaic_0001>
module attributes {stable_mosaic.version = 11 : i64} {
  func.func @_layernorm_kernel(%arg0: i32, %arg1: memref<16x32xf32, #tpu.memory_space<vmem>>, %arg2: memref<1x32xf32, #tpu.memory_space<vmem>>, %arg3: memref<1x32xf32, #tpu.memory_space<vmem>>, %arg4: memref<16x32xbf16, #tpu.memory_space<vmem>>) attributes {dimension_semantics = [#tpu.dimension_semantics<parallel>], iteration_bounds = array<i64: 1>, scalar_prefetch = 0 : i64, scratch_operands = 0 : i64, tpu.core_type = #tpu.core_type<tc>, window_params = [{transform_indices = @transform_0, window_bounds = array<i64: 16, 32>}, {pipeline_mode = #tpu.pipeline_mode<synchronous>, transform_indices = @transform_1, window_bounds = array<i64: 1, 32>}, {pipeline_mode = #tpu.pipeline_mode<synchronous>, transform_indices = @transform_2, window_bounds = array<i64: 1, 32>}, {transform_indices = @transform_3, window_bounds = array<i64: 16, 32>}]} {
    %c0 = arith.constant 0 : index
    %c0_0 = arith.constant 0 : index
    %0 = vector.load %arg1[%c0, %c0_0] : memref<16x32xf32, #tpu.memory_space<vmem>>, vector<16x32xf32>
    %cst = arith.constant dense<0.000000e+00> : vector<16xf32>
    %1 = vector.multi_reduction <add>, %0, %cst [1] : vector<16x32xf32> to vector<16xf32>
    %2 = vector.shape_cast %1 : vector<16xf32> to vector<16x1xf32>
    %cst_1 = arith.constant 3.200000e+01 : f32
    %3 = vector.broadcast %cst_1 : f32 to vector<16x1xf32>
    %4 = arith.divf %2, %3 : vector<16x1xf32>
    %5 = vector.broadcast %4 : vector<16x1xf32> to vector<16x32xf32>
    %6 = arith.subf %0, %5 : vector<16x32xf32>
    %7 = arith.mulf %6, %6 : vector<16x32xf32>
    %cst_2 = arith.constant dense<0.000000e+00> : vector<16xf32>
    %8 = vector.multi_reduction <add>, %7, %cst_2 [1] : vector<16x32xf32> to vector<16xf32>
    %9 = vector.shape_cast %8 : vector<16xf32> to vector<16x1xf32>
    %cst_3 = arith.constant 3.200000e+01 : f32
    %10 = vector.broadcast %cst_3 : f32 to vector<16x1xf32>
    %11 = arith.divf %9, %10 : vector<16x1xf32>
    %cst_4 = arith.constant 9.99999996E-13 : f32
    %12 = vector.broadcast %cst_4 : f32 to vector<16x1xf32>
    %13 = arith.addf %11, %12 : vector<16x1xf32>
    %14 = math.rsqrt %13 : vector<16x1xf32>
    %15 = vector.broadcast %14 : vector<16x1xf32> to vector<16x32xf32>
    %16 = arith.mulf %6, %15 : vector<16x32xf32>
    %c0_5 = arith.constant 0 : index
    %c0_6 = arith.constant 0 : index
    %17 = vector.load %arg2[%c0_5, %c0_6] : memref<1x32xf32, #tpu.memory_space<vmem>>, vector<1x32xf32>
    %18 = vector.broadcast %17 : vector<1x32xf32> to vector<16x32xf32>
    %19 = arith.mulf %16, %18 : vector<16x32xf32>
    %c0_7 = arith.constant 0 : index
    %c0_8 = arith.constant 0 : index
    %20 = vector.load %arg3[%c0_7, %c0_8] : memref<1x32xf32, #tpu.memory_space<vmem>>, vector<1x32xf32>
    %21 = vector.broadcast %20 : vector<1x32xf32> to vector<16x32xf32>
    %22 = arith.addf %19, %21 : vector<16x32xf32>
    %23 = arith.truncf %22 : vector<16x32xf32> to vector<16x32xbf16>
    %c0_9 = arith.constant 0 : index
    %c0_10 = arith.constant 0 : index
    %24 = vector.load %arg4[%c0_9, %c0_10] : memref<16x32xbf16, #tpu.memory_space<vmem>>, vector<16x32xbf16>
    tpu.vector_store %arg4[%c0_9, %c0_10], %23 {strides = array<i32>} : memref<16x32xbf16, #tpu.memory_space<vmem>>, vector<16x32xbf16>,
    return
  }
  func.func @transform_0(%arg0: i32) -> (i32, i32) {
    %c0_i32 = arith.constant 0 : i32
    %c0_i32_0 = arith.constant 0 : i32
    return %arg0, %c0_i32 : i32, i32
  }
  func.func @transform_1(%arg0: i32) -> (i32, i32) {
    %c0_i32 = arith.constant 0 : i32
    %c0_i32_0 = arith.constant 0 : i32
    %c0_i32_1 = arith.constant 0 : i32
    return %c0_i32, %c0_i32_0 : i32, i32
  }
  func.func @transform_2(%arg0: i32) -> (i32, i32) {
    %c0_i32 = arith.constant 0 : i32
    %c0_i32_0 = arith.constant 0 : i32
    %c0_i32_1 = arith.constant 0 : i32
    return %c0_i32, %c0_i32_0 : i32, i32
  }
  func.func @transform_3(%arg0: i32) -> (i32, i32) {
    %c0_i32 = arith.constant 0 : i32
    %c0_i32_0 = arith.constant 0 : i32
    return %arg0, %c0_i32 : i32, i32
  }
}

</mosaic_0001>

<bundles_post_ra>
// kernel: tpu_custom_call.1
= control target key start
LH: loop header
LB: loop body
LE: loop exit
PB: predicated region body
PF: predicated region fallthrough
CT: control target
= control target key end

     0   :  { %8 = vsyncpa [#allocation3], 0  ;;  %s229_s0 = inlined_call_operand.hbm [shape: f32[16,32], index: 0, kind: input, shape index: {}]   ;;  %s230_s1 = inlined_call_operand.vmem [shape: f32[1,32], index: 1, kind: input, shape index: {}]   ;;  %s231_s2 = inlined_call_operand.vmem [shape: f32[1,32], index: 2, kind: input, shape index: {}]   ;;  %s232_s3 = inlined_call_operand.hbm [shape: bf16[16,32], index: 3, kind: output, shape index: {}]  }
   0x1   :  { %9 = vsyncpa [#allocation4], 0  ;;  %s169_s12 = smov [#allocation2]   ;;  %s121_s16 = scalar_lea.hbm %s229_s0, 256 }
   0x2   :  { %s15_s13 = sshll.u32 %s169_s12, 4  ;;  %p122_p0 = scmp.ne.s32.totalorder %s229_s0, %s121_s16  ;;  %s16_s13 = int_to_ptr.vmem [resolvable:$true] %s15_s13 }
   0x3   :  { %p125_p1 = scmp.lt.u32.totalorder %s121_s16, %s229_s0 }
   0x5   :  { %p127_p2 = pnand %p125_p1, %p122_p0 }
   0x7   :  { %130 = shalt.err (!%p127_p2)
}
   0x8   :  { %s131_s21 = scalar_lea.vmem %s16_s13, 256  ;;  %p136_p4 = scmp.lt.s32.totalorder %s16_s13, %s16_s13 }
   0x9   :  { %p132_p3 = scmp.ne.s32.totalorder %s16_s13, %s131_s21  ;;  %p137_p5 = scmp.lt.s32.totalorder %s131_s21, %s131_s21 }
   0xb   :  { %p138_p6 = por %p137_p5, %p136_p4 }
   0xd   :  { %p139_p7 = pnand %p138_p6, %p132_p3 }
   0xf   :  { %142 = shalt.err (!%p139_p7)
}
  0x10   :  { %s170_s22 = smov 128   ;;  %s171_s23 = smov 8  }
  0x11   :  { %21 = dma.hbm_to_vmem [thread:$0]  %s229_s0, 256, %s16_s13, [#allocation3], %s170_s22, %s170_s22, %s171_s23  }
  0x12   :  { %165 = dma.done.wait [#allocation3], 256  }
  0x13   :  { %166 = vsyncadd [#allocation3], 4294967040  ;;  %vm31_vm0 = vcmask 261120   ;;  %v29_v0 = vld [vmem:[#allocation2] sm:$0xff]  ;;  %v30_v1 = vld [vmem:[#allocation2 + $0x8] sm:$0xff]  ;;  %vm85_vm1 = vcmask 257024  }
  0x14   :  { %v32_v2 = vsel %vm31_vm0, %v29_v0, 0.0  ;;  %v35_v3 = vsel %vm31_vm0, %v30_v1, 0.0  ;;  %v105_v21 = vld [vmem:[%s230_s1] ss:$0 sm:$0xff]  ;;  %s172_s29 = smov [#allocation5]  }
  0x15   :  { %33 = vadd.xlane.f32.xlu0 %v32_v2  ;;  %v106_v23 = vld [vmem:[%s231_s2] ss:$0 sm:$0xff]  ;;  %s93_s30 = sshll.u32 %s172_s29, 4  ;;  %s94_s30 = int_to_ptr.vmem [resolvable:$true] %s93_s30 }
  0x16   :  { %s143_s1 = scalar_lea.vmem %s94_s30, 128  ;;  %p148_p9 = scmp.lt.s32.totalorder %s94_s30, %s94_s30 }
  0x17   :  { %p144_p8 = scmp.ne.s32.totalorder %s94_s30, %s143_s1  ;;  %p149_p10 = scmp.lt.s32.totalorder %s143_s1, %s143_s1 }
  0x19   :  { %36 = vadd.xlane.f32.xlu0 %v35_v3  ;;  %p150_p11 = por %p149_p10, %p148_p9 }
  0x1b   :  { %p151_p12 = pnand %p150_p11, %p144_p8 }
  0xa2   :  { %v34_v4 = vpop.xlane.xlu0 %33 }
  0xa3   :  { %v39_v5 = vmul.f32 0.03125, %v34_v4 }
  0xa5   :  { %v41_v6 = vsub.f32 %v29_v0, %v39_v5 }
  0xa6   :  { %v37_v7 = vpop.xlane.xlu0 %36 }
  0xa7   :  { %v40_v8 = vmul.f32 0.03125, %v37_v7  ;;  %v43_v9 = vmul.f32 %v41_v6, %v41_v6 }
  0xa9   :  { %v42_v10 = vsub.f32 %v30_v1, %v40_v8  ;;  %v45_v11 = vsel %vm31_vm0, %v43_v9, 0.0 }
  0xaa   :  { %46 = vadd.xlane.f32.xlu1 %v45_v11 }
  0xab   :  { %v44_v12 = vmul.f32 %v42_v10, %v42_v10 }
  0xad   :  { %v48_v13 = vsel %vm31_vm0, %v44_v12, 0.0 }
  0xae   :  { %49 = vadd.xlane.f32.xlu1 %v48_v13 }
 0x137   :  { %v47_v14 = vpop.xlane.xlu1 %46 }
 0x138   :  { %v51_v15 = vmul.f32 0.03125, %v47_v14 }
 0x13a   :  { %v53_v16 = vadd.f32 1e-12, %v51_v15 }
 0x13b   :  { %v50_v17 = vpop.xlane.xlu1 %49 }
 0x13c   :  { %117 = vrsqrt.f32 %v53_v16  ;;  %v52_v18 = vmul.f32 0.03125, %v50_v17 }
 0x13e   :  { %v54_v19 = vadd.f32 1e-12, %v52_v18 }
 0x140   :  { %119 = vrsqrt.f32 %v54_v19 }
 0x146   :  { %v118_v20 = vpop.eup %117 }
 0x147   :  { %v57_v22 = vmul.f32 %v118_v20, %v41_v6 }
 0x149   :  { %v66_v24 = vmul.f32 %v105_v21, %v57_v22 }
 0x14a   :  { %v120_v25 = vpop.eup %119 }
 0x14b   :  { %v58_v26 = vmul.f32 %v120_v25, %v42_v10  ;;  %v75_v27 = vadd.f32 %v106_v23, %v66_v24 }
 0x14d   :  { %v67_v28 = vmul.f32 %v105_v21, %v58_v26  ;;  %v109_v29 = vpack.c.bf16 %v75_v27, %v75_v27 }
 0x14f   :  { %v76_v30 = vadd.f32 %v106_v23, %v67_v28  ;;  %86 = vst.msk [vmem:[#allocation5] sm:$0xf] %vm85_vm1, %v109_v29 }
 0x151   :  { %v110_v31 = vpack.c.bf16 %v76_v30, %v76_v30 }
 0x153   :  { %87 = vst.msk [vmem:[#allocation5 + $0x4] sm:$0xf] %vm85_vm1, %v110_v31 }
 0x154   :  { %154 = shalt.err (!%p151_p12)
}
 0x155   :  { %s155_s5 = scalar_lea.hbm %s232_s3, 128 }
 0x156   :  { %p156_p13 = scmp.ne.s32.totalorder %s232_s3, %s155_s5  ;;  %p159_p0 = scmp.lt.u32.totalorder %s155_s5, %s232_s3 }
 0x158   :  { %p161_p1 = pnand %p159_p0, %p156_p13 }
 0x15a   :  { %164 = shalt.err (!%p161_p1)
}
 0x15b   :  { %s173_s10 = smov 64   ;;  %s174_s11 = smov 4  }
 0x15c   :  { %99 = dma.vmem_to_hbm [thread:$0]  %s94_s30, 128, %s232_s3, [#allocation4], %s173_s10, %s173_s10, %s174_s11  }
 0x15d   :  { %167 = dma.done.wait [#allocation4], 128  }
 0x15e   :  { %168 = vsyncadd [#allocation4], 4294967168 }
 0x15f   :  { %103 = vsyncpa [#allocation3], 1 }
 0x160   :  { %104 = vsyncpa [#allocation4], 1 }

</bundles_post_ra>
